<compile_context>
chip_gen: v5e
topology: v5e:2x2
jax: 0.10.0
libtpu: 0.0.40
codegen_flags: <defaults>
</compile_context>

<pallas_src>
import functools

import jax
import jax.numpy as jnp
from jax.experimental import pallas as pl
from jax.experimental.pallas import tpu as pltpu


def _upconv_kernel(x_ref, w_ref, o_ref, *, negative_slope, eps, hw, compute_dtype):
    # x_ref: (1, C_in, HW)   w_ref: (4, c_tile, C_in)   o_ref: (1, c_tile, 4*HW)
    x = x_ref[0].astype(compute_dtype)                      # (C_in, HW)

    # Transpose-conv hot path: one MXU matmul per kernel position, written
    # straight into the lane-block of the output tile it belongs to.
    for k in range(4):
        wk = w_ref[k].astype(compute_dtype)                 # (c_tile, C_in)
        o_ref[0, :, k * hw:(k + 1) * hw] = jnp.dot(
            wk, x, preferred_element_type=jnp.float32).astype(o_ref.dtype)

    # Instance-norm statistics: each output row holds ALL 4*HW spatial
    # positions of one (n, c) pair, so stats are a plain lane reduction.
    y = o_ref[0].astype(jnp.float32)                        # (c_tile, 4*HW)
    n_elem = 4 * hw
    mean = jnp.sum(y, axis=1, keepdims=True) / n_elem       # (c_tile, 1)
    var = jnp.sum(y * y, axis=1, keepdims=True) / n_elem - mean * mean
    var = jnp.maximum(var, 0.0)                             # guard f32 cancellation
    inv = jax.lax.rsqrt(var + eps)

    yn = (y - mean) * inv
    o_ref[0] = jnp.where(yn >= 0, yn, negative_slope * yn).astype(o_ref.dtype)


def _pick_c_tile(c_out, hw, budget_bytes=4 << 20):
    """Largest channel tile whose f32 output block fits the VMEM budget.

    Must be either c_out itself (full-dim exception) or a multiple of 8 that
    divides c_out, so the block second-minor dim satisfies the (8, 128) rule.
    """
    full_bytes = c_out * 4 * hw * 4
    if full_bytes <= budget_bytes or c_out < 8:
        return c_out
    best = None
    for ct in range(8, c_out, 8):
        if c_out % ct == 0 and ct * 4 * hw * 4 <= budget_bytes:
            best = ct
    return best if best is not None else c_out


def up_conv_block(x_nchw, weight, *, negative_slope=0.2, eps=1e-5,
                  compute_dtype=None):
    """x_nchw: (N, C_in, H, W); weight: (C_in, C_out, 2, 2) (PyTorch layout).

    Returns (N, C_out, 2H, 2W) float32, matching UpConvBlock.forward.
    """
    n, c_in, h, w = x_nchw.shape
    c_out = weight.shape[1]
    hw = h * w

    if compute_dtype is None:
        # bf16 matmul inputs only pay off at real decoder channel counts.
        compute_dtype = jnp.bfloat16 if c_in >= 256 else jnp.float32

    # Input: pure reshape, no HBM transpose.
    x_flat = x_nchw.reshape(n, c_in, hw)
    # Weight: (C_in, C_out, kh, kw) -> (kh*kw, C_out, C_in); tiny tensor.
    w_flat = jnp.transpose(weight, (2, 3, 1, 0)).reshape(4, c_out, c_in)

    c_tile = _pick_c_tile(c_out, hw)
    n_ct = c_out // c_tile

    # NOTE: if C_in * HW itself outgrows VMEM, an HW grid axis with cross-tile
    # stat accumulation (two-pass) would be needed; not required at these sizes.
    elt = 4
    x_blk = c_in * hw * elt
    o_blk = c_tile * 4 * hw * elt
    w_blk = 4 * c_tile * c_in * elt
    vmem_limit = int(min(100 << 20,
                         max(32 << 20, 3 * (x_blk + o_blk + w_blk) + (8 << 20))))

    kernel = functools.partial(_upconv_kernel,
                               negative_slope=negative_slope, eps=eps,
                               hw=hw, compute_dtype=compute_dtype)

    out_flat = pl.pallas_call(
        kernel,
        out_shape=jax.ShapeDtypeStruct((n, c_out, 4 * hw), jnp.float32),
        grid_spec=pltpu.PrefetchScalarGridSpec(
            num_scalar_prefetch=0,
            grid=(n, n_ct),
            in_specs=[
                pl.BlockSpec((1, c_in, hw), lambda b, j: (b, 0, 0)),
                pl.BlockSpec((4, c_tile, c_in), lambda b, j: (0, j, 0)),
            ],
            out_specs=pl.BlockSpec((1, c_tile, 4 * hw), lambda b, j: (b, j, 0)),
        ),
        compiler_params=pltpu.CompilerParams(
            dimension_semantics=("parallel", "parallel"),
            vmem_limit_bytes=vmem_limit),
    )(x_flat, w_flat)

    # (N, C_out, 4*HW) lanes ordered (kh, kw, h, w)
    #   -> (N, C_out, kh, kw, H, W) -> (N, C_out, H, kh, W, kw) -> (N, C_out, 2H, 2W)
    out = out_flat.reshape(n, c_out, 2, 2, h, w)
    out = jnp.transpose(out, (0, 1, 4, 2, 5, 3)).reshape(n, c_out, 2 * h, 2 * w)
    return out


def _reference(x, weight, negative_slope=0.2, eps=1e-5):
    """Pure-JAX reference matching the PyTorch module."""
    n, c_in, h, w = x.shape
    c_out = weight.shape[1]
    y = jnp.einsum('nihw,iokl->nohkwl', x, weight)          # (n, co, h, kh, w, kw)
    y = y.reshape(n, c_out, 2 * h, 2 * w)
    mean = y.mean(axis=(2, 3), keepdims=True)
    var = y.var(axis=(2, 3), keepdims=True)                 # biased, like PyTorch
    y = (y - mean) * jax.lax.rsqrt(var + eps)
    return jnp.where(y >= 0, y, negative_slope * y)


if __name__ == "__main__":
    key = jax.random.PRNGKey(0)
    k_x, k_w = jax.random.split(key)

    batch, in_chans, out_chans, size = 2, 4, 8, 16
    x = jax.random.normal(k_x, (batch, in_chans, size, size), dtype=jnp.float32)
    # ConvTranspose2d weight shape: (in_chans, out_chans, 2, 2); deterministic init.
    weight = jax.random.normal(k_w, (in_chans, out_chans, 2, 2),
                               dtype=jnp.float32) * 0.1

    out = up_conv_block(x, weight)
    out = jax.block_until_ready(out)

    assert out.shape == (batch, out_chans, 2 * size, 2 * size), out.shape
    assert out.dtype == jnp.float32

    ref = _reference(x, weight)
    max_err = float(jnp.max(jnp.abs(out - ref)))
    assert jnp.allclose(out, ref, atol=2e-3, rtol=2e-3), max_err

    print("KERNEL_OK")
</pallas_src>

<mosaic_0001>
module attributes {stable_mosaic.version = 11 : i64} {
  func.func @_upconv_kernel(%arg0: i32, %arg1: i32, %arg2: memref<1x4x256xf32, #tpu.memory_space<vmem>>, %arg3: memref<4x8x4xf32, #tpu.memory_space<vmem>>, %arg4: memref<1x8x1024xf32, #tpu.memory_space<vmem>>) attributes {dimension_semantics = [#tpu.dimension_semantics<parallel>, #tpu.dimension_semantics<parallel>], iteration_bounds = array<i64: 2, 1>, scalar_prefetch = 0 : i64, scratch_operands = 0 : i64, tpu.core_type = #tpu.core_type<tc>, window_params = [{transform_indices = @transform_0, window_bounds = array<i64: 1, 4, 256>}, {transform_indices = @transform_1, window_bounds = array<i64: 4, 8, 4>}, {transform_indices = @transform_2, window_bounds = array<i64: 1, 8, 1024>}]} {
    %c0 = arith.constant 0 : index
    %c0_0 = arith.constant 0 : index
    %c0_1 = arith.constant 0 : index
    %0 = vector.load %arg2[%c0, %c0_0, %c0_1] : memref<1x4x256xf32, #tpu.memory_space<vmem>>, vector<1x4x256xf32>
    %1 = vector.shape_cast %0 : vector<1x4x256xf32> to vector<4x256xf32>
    %c0_2 = arith.constant 0 : index
    %c0_3 = arith.constant 0 : index
    %c0_4 = arith.constant 0 : index
    %2 = vector.load %arg3[%c0_2, %c0_3, %c0_4] : memref<4x8x4xf32, #tpu.memory_space<vmem>>, vector<1x8x4xf32>
    %3 = vector.shape_cast %2 : vector<1x8x4xf32> to vector<8x4xf32>
    %cst = arith.constant dense<0.000000e+00> : vector<8x256xf32>
    %4 = tpu.matmul %3, %1, %cst {dimension_numbers = #tpu.dot_dimension_numbers<[1], [0], [0], [1], [0, 0, 1, 1], [], []>} : vector<8x4xf32>, vector<4x256xf32>, vector<8x256xf32> -> vector<8x256xf32>
    %c0_5 = arith.constant 0 : index
    %c0_6 = arith.constant 0 : index
    %c0_7 = arith.constant 0 : index
    %5 = vector.load %arg4[%c0_5, %c0_6, %c0_7] : memref<1x8x1024xf32, #tpu.memory_space<vmem>>, vector<1x8x256xf32>
    %6 = vector.shape_cast %5 : vector<1x8x256xf32> to vector<8x256xf32>
    %7 = vector.shape_cast %4 : vector<8x256xf32> to vector<1x8x256xf32>
    tpu.vector_store %arg4[%c0_5, %c0_6, %c0_7], %7 {strides = array<i32>} : memref<1x8x1024xf32, #tpu.memory_space<vmem>>, vector<1x8x256xf32>,
    %c1 = arith.constant 1 : index
    %c0_8 = arith.constant 0 : index
    %c0_9 = arith.constant 0 : index
    %8 = vector.load %arg3[%c1, %c0_8, %c0_9] : memref<4x8x4xf32, #tpu.memory_space<vmem>>, vector<1x8x4xf32>
    %9 = vector.shape_cast %8 : vector<1x8x4xf32> to vector<8x4xf32>
    %cst_10 = arith.constant dense<0.000000e+00> : vector<8x256xf32>
    %10 = tpu.matmul %9, %1, %cst_10 {dimension_numbers = #tpu.dot_dimension_numbers<[1], [0], [0], [1], [0, 0, 1, 1], [], []>} : vector<8x4xf32>, vector<4x256xf32>, vector<8x256xf32> -> vector<8x256xf32>
    %c0_11 = arith.constant 0 : index
    %c0_12 = arith.constant 0 : index
    %c256 = arith.constant 256 : index
    %11 = vector.load %arg4[%c0_11, %c0_12, %c256] : memref<1x8x1024xf32, #tpu.memory_space<vmem>>, vector<1x8x256xf32>
    %12 = vector.shape_cast %11 : vector<1x8x256xf32> to vector<8x256xf32>
    %13 = vector.shape_cast %10 : vector<8x256xf32> to vector<1x8x256xf32>
    tpu.vector_store %arg4[%c0_11, %c0_12, %c256], %13 {strides = array<i32>} : memref<1x8x1024xf32, #tpu.memory_space<vmem>>, vector<1x8x256xf32>,
    %c2 = arith.constant 2 : index
    %c0_13 = arith.constant 0 : index
    %c0_14 = arith.constant 0 : index
    %14 = vector.load %arg3[%c2, %c0_13, %c0_14] : memref<4x8x4xf32, #tpu.memory_space<vmem>>, vector<1x8x4xf32>
    %15 = vector.shape_cast %14 : vector<1x8x4xf32> to vector<8x4xf32>
    %cst_15 = arith.constant dense<0.000000e+00> : vector<8x256xf32>
    %16 = tpu.matmul %15, %1, %cst_15 {dimension_numbers = #tpu.dot_dimension_numbers<[1], [0], [0], [1], [0, 0, 1, 1], [], []>} : vector<8x4xf32>, vector<4x256xf32>, vector<8x256xf32> -> vector<8x256xf32>
    %c0_16 = arith.constant 0 : index
    %c0_17 = arith.constant 0 : index
    %c512 = arith.constant 512 : index
    %17 = vector.load %arg4[%c0_16, %c0_17, %c512] : memref<1x8x1024xf32, #tpu.memory_space<vmem>>, vector<1x8x256xf32>
    %18 = vector.shape_cast %17 : vector<1x8x256xf32> to vector<8x256xf32>
    %19 = vector.shape_cast %16 : vector<8x256xf32> to vector<1x8x256xf32>
    tpu.vector_store %arg4[%c0_16, %c0_17, %c512], %19 {strides = array<i32>} : memref<1x8x1024xf32, #tpu.memory_space<vmem>>, vector<1x8x256xf32>,
    %c3 = arith.constant 3 : index
    %c0_18 = arith.constant 0 : index
    %c0_19 = arith.constant 0 : index
    %20 = vector.load %arg3[%c3, %c0_18, %c0_19] : memref<4x8x4xf32, #tpu.memory_space<vmem>>, vector<1x8x4xf32>
    %21 = vector.shape_cast %20 : vector<1x8x4xf32> to vector<8x4xf32>
    %cst_20 = arith.constant dense<0.000000e+00> : vector<8x256xf32>
    %22 = tpu.matmul %21, %1, %cst_20 {dimension_numbers = #tpu.dot_dimension_numbers<[1], [0], [0], [1], [0, 0, 1, 1], [], []>} : vector<8x4xf32>, vector<4x256xf32>, vector<8x256xf32> -> vector<8x256xf32>
    %c0_21 = arith.constant 0 : index
    %c0_22 = arith.constant 0 : index
    %c768 = arith.constant 768 : index
    %23 = vector.load %arg4[%c0_21, %c0_22, %c768] : memref<1x8x1024xf32, #tpu.memory_space<vmem>>, vector<1x8x256xf32>
    %24 = vector.shape_cast %23 : vector<1x8x256xf32> to vector<8x256xf32>
    %25 = vector.shape_cast %22 : vector<8x256xf32> to vector<1x8x256xf32>
    tpu.vector_store %arg4[%c0_21, %c0_22, %c768], %25 {strides = array<i32>} : memref<1x8x1024xf32, #tpu.memory_space<vmem>>, vector<1x8x256xf32>,
    %c0_23 = arith.constant 0 : index
    %c0_24 = arith.constant 0 : index
    %c0_25 = arith.constant 0 : index
    %26 = vector.load %arg4[%c0_23, %c0_24, %c0_25] : memref<1x8x1024xf32, #tpu.memory_space<vmem>>, vector<1x8x1024xf32>
    %27 = vector.shape_cast %26 : vector<1x8x1024xf32> to vector<8x1024xf32>
    %cst_26 = arith.constant dense<0.000000e+00> : vector<8xf32>
    %28 = vector.multi_reduction <add>, %27, %cst_26 [1] : vector<8x1024xf32> to vector<8xf32>
    %29 = vector.shape_cast %28 : vector<8xf32> to vector<8x1xf32>
    %cst_27 = arith.constant 1.024000e+03 : f32
    %30 = vector.broadcast %cst_27 : f32 to vector<8x1xf32>
    %31 = arith.divf %29, %30 : vector<8x1xf32>
    %32 = arith.mulf %27, %27 : vector<8x1024xf32>
    %cst_28 = arith.constant dense<0.000000e+00> : vector<8xf32>
    %33 = vector.multi_reduction <add>, %32, %cst_28 [1] : vector<8x1024xf32> to vector<8xf32>
    %34 = vector.shape_cast %33 : vector<8xf32> to vector<8x1xf32>
    %cst_29 = arith.constant 1.024000e+03 : f32
    %35 = vector.broadcast %cst_29 : f32 to vector<8x1xf32>
    %36 = arith.divf %34, %35 : vector<8x1xf32>
    %37 = arith.mulf %31, %31 : vector<8x1xf32>
    %38 = arith.subf %36, %37 : vector<8x1xf32>
    %cst_30 = arith.constant 0.000000e+00 : f32
    %39 = vector.broadcast %cst_30 : f32 to vector<8x1xf32>
    %40 = arith.maximumf %38, %39 : vector<8x1xf32>
    %cst_31 = arith.constant 9.99999974E-6 : f32
    %41 = vector.broadcast %cst_31 : f32 to vector<8x1xf32>
    %42 = arith.addf %40, %41 : vector<8x1xf32>
    %43 = math.rsqrt %42 : vector<8x1xf32>
    %44 = vector.broadcast %31 : vector<8x1xf32> to vector<8x1024xf32>
    %45 = arith.subf %27, %44 : vector<8x1024xf32>
    %46 = vector.broadcast %43 : vector<8x1xf32> to vector<8x1024xf32>
    %47 = arith.mulf %45, %46 : vector<8x1024xf32>
    %cst_32 = arith.constant 0.000000e+00 : f32
    %48 = vector.broadcast %cst_32 : f32 to vector<8x1024xf32>
    %49 = arith.cmpf oge, %47, %48 : vector<8x1024xf32>
    %cst_33 = arith.constant 2.000000e-01 : f32
    %50 = vector.broadcast %cst_33 : f32 to vector<8x1024xf32>
    %51 = arith.mulf %50, %47 : vector<8x1024xf32>
    %52 = arith.select %49, %47, %51 : vector<8x1024xi1>, vector<8x1024xf32>
    %c0_34 = arith.constant 0 : index
    %c0_35 = arith.constant 0 : index
    %c0_36 = arith.constant 0 : index
    %53 = vector.load %arg4[%c0_34, %c0_35, %c0_36] : memref<1x8x1024xf32, #tpu.memory_space<vmem>>, vector<1x8x1024xf32>
    %54 = vector.shape_cast %53 : vector<1x8x1024xf32> to vector<8x1024xf32>
    %55 = vector.shape_cast %52 : vector<8x1024xf32> to vector<1x8x1024xf32>
    tpu.vector_store %arg4[%c0_34, %c0_35, %c0_36], %55 {strides = array<i32>} : memref<1x8x1024xf32, #tpu.memory_space<vmem>>, vector<1x8x1024xf32>,
    return
  }
  func.func @transform_0(%arg0: i32, %arg1: i32) -> (i32, i32, i32) {
    %c0_i32 = arith.constant 0 : i32
    %c0_i32_0 = arith.constant 0 : i32
    %c0_i32_1 = arith.constant 0 : i32
    return %arg0, %c0_i32, %c0_i32_0 : i32, i32, i32
  }
  func.func @transform_1(%arg0: i32, %arg1: i32) -> (i32, i32, i32) {
    %c0_i32 = arith.constant 0 : i32
    %c0_i32_0 = arith.constant 0 : i32
    %c0_i32_1 = arith.constant 0 : i32
    return %c0_i32, %arg1, %c0_i32_0 : i32, i32, i32
  }
  func.func @transform_2(%arg0: i32, %arg1: i32) -> (i32, i32, i32) {
    %c0_i32 = arith.constant 0 : i32
    %c0_i32_0 = arith.constant 0 : i32
    return %arg0, %arg1, %c0_i32 : i32, i32, i32
  }
}

</mosaic_0001>

<bundles_post_ra>
// kernel: tpu_custom_call.1
= control target key start
LH: loop header
LB: loop body
LE: loop exit
PB: predicated region body
PF: predicated region fallthrough
CT: control target
= control target key end

     0   :  { %7 = vsyncpa [#allocation3], 0  ;;  %s954_s0 = inlined_call_operand.vmem [shape: f32[2,4,256], index: 0, kind: input, shape index: {}]   ;;  %s955_s1 = inlined_call_operand.vmem [shape: f32[4,8,4], index: 1, kind: input, shape index: {}]   ;;  %s956_s2 = inlined_call_operand.hbm [shape: f32[2,8,1024], index: 2, kind: output, shape index: {}]  }
   0x1   :  { %9 = vsyncpa [#allocation3 + $0x1], 0  ;;  %s792_s9 = smov 0   ;;  %s794_s10 = smov 0  }
   0x2   :  { %s796_s11 = smov 0   ;;  %s798_s12 = smov 0  }
   0x3   :  { %s800_s13 = smov 0   ;;  %s802_s14 = smov 0  }
   0x4 LB: > { %s601_s15 = sadd.s32 4294967295, %s774_s14   ;;  %s602_s16 = sadd.s32 4294967294, %s774_s14   ;;  %s774_s14 = sphi %s802_s14, %s15_s14   ;;  %s770_s13 = sphi %s800_s13, %s963_s13   ;;  %s766_s12 = sphi %s798_s12, %s962_s12   ;;  %s762_s11 = sphi %s796_s11, %s961_s11   ;;  %s758_s10 = sphi %s794_s10, %s960_s10   ;;  %s754_s9 = sphi %s792_s9, %s959_s9  }
   0x5   : > { %s27_s17 = sadd.s32 1, %s770_s13  ;;  %s88_s18 = sadd.s32 1, %s762_s11 }
   0x6   : > { %p29_p0 = scmp.ge.s32.totalorder %s27_s17, 2  ;;  %p98_p1 = scmp.ne.s32.totalorder %s762_s11, %s758_s10 }
   0x7   : > { %p99_p2 = scmp.eq.s32.totalorder %s601_s15, 1  ;;  %p104_p3 = scmp.ne.s32.totalorder %s758_s10, %s754_s9 }
   0x8   : > { %s965_s17 = smov (%p29_p0, %s27_s17), 0  ;;  %p105_p5 = scmp.eq.s32.totalorder %s602_s16, 1 }
   0x9   : > { %p832_p4 = por %p99_p2, %p98_p1  ;;  %s83_s20 = ssub.s32 %s770_s13, %s965_s17 }
   0xa   : > { %p606_p6 = scmp.ge.s32.totalorder %s774_s14, 1  ;;  %p86_p7 = scmp.eq.s32.totalorder %s83_s20, 0 }
   0xb   : > { %p839_p8 = por %p105_p5, %p104_p3  ;;  %p138_p9 = scmp.lt.s32.totalorder %s774_s14, 3 }
   0xc   : > { %s845_s22 = scalar_select %p86_p7, %s762_s11, %s88_s18  }
   0xd   : > { %p139_p10 = pnand %p606_p6, %p138_p9 }
   0xe   : > { %p164_p11 = scmp.lt.s32.totalorder (!%p139_p10), %s766_s12, 1  ;;  %s161_s8 = sand.u32 (!%p139_p10), 1, %s758_s10  }
   0xf   : > { %142 = sbr.rel (%p139_p10) target bundleno = 360 (0x168), region = 28  ;;  %s607_s15 = sshll.u32 (!%p139_p10), %s161_s8, 6 }
  0x10   : > { %s635_s16 = sshll.u32 (!%p139_p10), %s766_s12, 6  ;;  %s498_s26 = scalar_lea.sflag (!%p139_p10), [#allocation3], %s161_s8 }
  0x11   : > { %s716_s3 = scalar_lea.hbm (!%p139_p10), %s956_s2, 128 }
  0x14   : > { %s165_s23 = scalar_select %p164_p11, %s766_s12, 1  ;;  %vm183_vm0 = vcmask 1043456   ;;  %v174_v1 = vld [vmem:[%s955_s1] sm:$0xff]  ;;  %vm179_vm1 = vcmask 31744   ;;  %v614_v4 = vld [vmem:[%s955_s1 + $0x8] sm:$0xff]  ;;  %v619_v7 = vld [vmem:[%s955_s1 + $0x10] sm:$0xff] }
  0x15   : > { %v624_v10 = vld [vmem:[%s955_s1 + $0x18] sm:$0xff]  ;;  %v776_v43 = vmov 1024.0   ;;  %s163_s12 = scalar_lea.vmem [#allocation2], %s607_s15 }
  0x16   : > { %s634_s24 = sshll.u32 %s165_s23, 3  ;;  %692 = vrcp.f32 %v776_v43  ;;  %s511_s23 = scalar_lea.hbm %s956_s2, %s635_s16 }
  0x17   : > { %s168_s27 = scalar_lea.vmem %s954_s0, %s634_s24  ;;  %s513_s24 = sshll.u32 %s163_s12, 4  ;;  %s514_s24 = int_to_ptr.vmem [resolvable:$true] %s513_s24 }
  0x18   : > { %v173_v0 = vld [vmem:[%s168_s27] sm:$0xff]  ;;  %s515_s25 = sshll.u32 %s511_s23, 4  ;;  %s516_s25 = int_to_ptr.hbm [resolvable:$true] %s515_s25 }
  0x19   : > { %176 = vst [vmem:[#allocation1] ss:$2 sm:$0xff] %v173_v0  ;;  %s710_s27 = sshra.s32 %s516_s25, 4  ;;  %s711_s27 = int_to_ptr.hbm [resolvable:$true] %s710_s27 }
  0x1a   : > { %s712_s28 = scalar_lea.hbm %s711_s27, 64  ;;  %p717_p1 = scmp.lt.s32.totalorder %s711_s27, %s956_s2 }
  0x1b   : > { %p713_p12 = scmp.ne.s32.totalorder %s711_s27, %s712_s28  ;;  %p718_p2 = scmp.lt.s32.totalorder %s716_s3, %s712_s28 }
  0x1c   : > { %v693_v44 = vpop.eup %692 }
  0x1d   : > { %v410_v45 = vmul.f32 1024.0, %v693_v44  ;;  %vm414_vm2 = vweird.f32 %v693_v44  ;;  %p714_p13 = pnand %p713_p12, %p832_p4  ;;  %p719_p3 = por %p718_p2, %p717_p1 }
  0x1f   : > { %v411_v46 = vsub.f32 1.0, %v410_v45  ;;  %p715_p0 = pneg %p714_p13 }
  0x20   : > { %v177_v2 = vld.sshfl [vmem:[#allocation1] sm:$0xff pattern:$0x75316420]  ;;  %v178_v3 = vld.sshfl [vmem:[#allocation1 + $0x8] sm:$0xff pattern:$0x75316420] }
  0x21   : > { %232 = vst [vmem:[#allocation1] ss:$2 sm:$0xff] %v173_v0  ;;  %610 = vmatpush.msk.msra.mxu0 %vm183_vm0, %v177_v2  ;;  %612 = vmatpush.msk.msra.mxu1 %vm183_vm0, %v178_v3  ;;  %v412_v47 = vmul.f32 %v693_v44, %v411_v46  ;;  %p720_p5 = pnand %p719_p3, %p715_p0 }
  0x22   : > { %611 = vmatmul.msk.f32.vlgmr.msra.gmra.mxu0 %vm179_vm1, %v174_v1  ;;  %613 = vmatmul.msk.f32.vlgmr.msra.gmra.mxu1 %vm179_vm1, %v174_v1 }
  0x23   : > { %v413_v48 = vadd.f32 %v693_v44, %v412_v47 }
  0x25   : > { %v415_v50 = vsel %vm414_vm2, %v693_v44, %v413_v48 }
  0x28   : > { %v233_v5 = vld.sshfl [vmem:[#allocation1] sm:$0xff pattern:$0x75316420]  ;;  %v234_v6 = vld.sshfl [vmem:[#allocation1 + $0x8] sm:$0xff pattern:$0x75316420] }
  0x29   : > { %615 = vmatpush.msk.msra.mxu2 %vm183_vm0, %v233_v5  ;;  %617 = vmatpush.msk.msra.mxu3 %vm183_vm0, %v234_v6  ;;  %286 = vst [vmem:[#allocation1] ss:$2 sm:$0xff] %v173_v0 }
  0x2a   : > { %616 = vmatmul.msk.f32.vlgmr.msra.gmra.mxu2 %vm179_vm1, %v614_v4  ;;  %618 = vmatmul.msk.f32.vlgmr.msra.gmra.mxu3 %vm179_vm1, %v614_v4 }
  0x30   : > { %v287_v8 = vld.sshfl [vmem:[#allocation1] sm:$0xff pattern:$0x75316420]  ;;  %v288_v9 = vld.sshfl [vmem:[#allocation1 + $0x8] sm:$0xff pattern:$0x75316420] }
  0x31   : > { %340 = vst [vmem:[#allocation1] ss:$2 sm:$0xff] %v173_v0  ;;  %620 = vmatpush.msk.msrb.mxu0 %vm183_vm0, %v287_v8  ;;  %622 = vmatpush.msk.msrb.mxu1 %vm183_vm0, %v288_v9 }
  0x32   : > { %621 = vmatmul.msk.f32.vlgmr.msrb.gmra.mxu0 %vm179_vm1, %v619_v7  ;;  %623 = vmatmul.msk.f32.vlgmr.msrb.gmra.mxu1 %vm179_vm1, %v619_v7 }
  0x38   : > { %v341_v11 = vld.sshfl [vmem:[#allocation1] sm:$0xff pattern:$0x75316420]  ;;  %v342_v12 = vld.sshfl [vmem:[#allocation1 + $0x8] sm:$0xff pattern:$0x75316420] }
  0x39   : > { %625 = vmatpush.msk.msrb.mxu2 %vm183_vm0, %v341_v11  ;;  %627 = vmatpush.msk.msrb.mxu3 %vm183_vm0, %v342_v12 }
  0x3a   : > { %626 = vmatmul.msk.f32.vlgmr.msrb.gmra.mxu2 %vm179_vm1, %v624_v10  ;;  %628 = vmatmul.msk.f32.vlgmr.msrb.gmra.mxu3 %vm179_vm1, %v624_v10 }
  0x9f   : > { %v880_v13 = vpop.f32.mrf.mxu1  ;;  %v882_v14 = vpop.f32.mrf.mxu0 }
  0xa0   : > { %v400_v15 = vadd.f32 %v880_v13, %v882_v14  ;;  %v417_v17 = vmul.f32 %v882_v14, %v882_v14  ;;  %v418_v18 = vmul.f32 %v880_v13, %v880_v13 }
  0xa2   : > { %v425_v22 = vadd.f32 %v418_v18, %v417_v17 }
  0xad   : > { %v886_v16 = vpop.f32.mrf.mxu2  ;;  %v893_v20 = vpop.f32.mrf.mxu3 }
  0xae   : > { %v401_v19 = vadd.f32 %v400_v15, %v886_v16  ;;  %v419_v21 = vmul.f32 %v886_v16, %v886_v16  ;;  %v420_v25 = vmul.f32 %v893_v20, %v893_v20 }
  0xaf   : > { %v898_v24 = vpop.f32.mrf.mxu0  ;;  %v333_v28 = vpop.f32.mrf.mxu1 }
  0xb0   : > { %v402_v23 = vadd.f32 %v401_v19, %v893_v20  ;;  %v426_v26 = vadd.f32 %v425_v22, %v419_v21  ;;  %v421_v29 = vmul.f32 %v898_v24, %v898_v24  ;;  %v422_v35 = vmul.f32 %v333_v28, %v333_v28 }
  0xb2   : > { %v403_v27 = vadd.f32 %v402_v23, %v898_v24  ;;  %v427_v30 = vadd.f32 %v426_v26, %v420_v25 }
  0xb4   : > { %v404_v31 = vadd.f32 %v403_v27, %v333_v28  ;;  %v428_v36 = vadd.f32 %v427_v30, %v421_v29 }
  0xb6   : > { %v429_v39 = vadd.f32 %v428_v36, %v422_v35 }
  0xbd   : > { %v367_v32 = vpop.f32.mrf.mxu2  ;;  %v387_v33 = vpop.f32.mrf.mxu3 }
  0xbe   : > { %v405_v34 = vadd.f32 %v404_v31, %v367_v32  ;;  %v423_v38 = vmul.f32 %v367_v32, %v367_v32  ;;  %v424_v40 = vmul.f32 %v387_v33, %v387_v33 }
  0xc0   : > { %v406_v37 = vadd.f32 %v405_v34, %v387_v33  ;;  %v430_v41 = vadd.f32 %v429_v39, %v423_v38 }
  0xc2   : > { %407 = vadd.xlane.f32.xlu0 %v406_v37  ;;  %v431_v42 = vadd.f32 %v430_v41, %v424_v40 }
  0xca   : > { %432 = vadd.xlane.f32.xlu0 %v431_v42 }
 0x135   : > { %v408_v49 = vpop.xlane.xlu0 %407 }
 0x136   : > { %v416_v51 = vmul.f32 %v415_v50, %v408_v49 }
 0x138   : > { %v435_v53 = vmul.f32 %v416_v51, %v416_v51  ;;  %v449_v63 = vsub.f32 %v882_v14, %v416_v51  ;;  %v450_v1 = vsub.f32 %v880_v13, %v416_v51  ;;  %v451_v2 = vsub.f32 %v886_v16, %v416_v51 }
 0x139   : > { %v452_v3 = vsub.f32 %v893_v20, %v416_v51  ;;  %v453_v4 = vsub.f32 %v898_v24, %v416_v51  ;;  %v454_v5 = vsub.f32 %v333_v28, %v416_v51  ;;  %v455_v6 = vsub.f32 %v367_v32, %v416_v51 }
 0x13a   : > { %v456_v7 = vsub.f32 %v387_v33, %v416_v51 }
 0x13d   : > { %v433_v52 = vpop.xlane.xlu0 %432 }
 0x13e   : > { %v434_v54 = vmul.f32 %v433_v52, %v415_v50 }
 0x140   : > { %v436_v55 = vsub.f32 %v434_v54, %v435_v53 }
 0x142   : > { %v437_v56 = vmax.f32 %v436_v55, 0.0 }
 0x144   : > { %v438_v57 = vadd.f32 1e-05, %v437_v56 }
 0x146   : > { %694 = vrsqrt.f32 %v438_v57  ;;  %vm445_vm4 = vweird.f32 %v438_v57 }
 0x14c   : > { %v695_v58 = vpop.eup %694 }
 0x14d   : > { %v440_v59 = vmul.f32 %v695_v58, %v438_v57  ;;  %vm446_vm3 = vweird.f32 %v695_v58 }
 0x14e   : > { %vm447_vm5 = vmor %vm445_vm4, %vm446_vm3 }
 0x14f   : > { %v441_v60 = vmul.f32 %v695_v58, %v440_v59 }
 0x151   : > { %v442_v61 = vmul.f32 0.5, %v441_v60 }
 0x153   : > { %v443_v62 = vsub.f32 1.5, %v442_v61 }
 0x155   : > { %v444_v0 = vmul.f32 %v695_v58, %v443_v62 }
 0x157   : > { %v448_v8 = vsel %vm447_vm5, %v695_v58, %v444_v0 }
 0x158   : > { %v457_v9 = vmul.f32 %v449_v63, %v448_v8  ;;  %v458_v10 = vmul.f32 %v450_v1, %v448_v8  ;;  %v459_v11 = vmul.f32 %v451_v2, %v448_v8  ;;  %v460_v12 = vmul.f32 %v452_v3, %v448_v8 }
 0x159   : > { %v461_v14 = vmul.f32 %v453_v4, %v448_v8  ;;  %v462_v13 = vmul.f32 %v454_v5, %v448_v8  ;;  %v463_v15 = vmul.f32 %v455_v6, %v448_v8  ;;  %v464_v16 = vmul.f32 %v456_v7, %v448_v8 }
 0x15a   : > { %vm465_vm6 = vcmp.ge.f32.partialorder %v457_v9, 0.0  ;;  %vm466_vm7 = vcmp.ge.f32.partialorder %v458_v10, 0.0  ;;  %vm467_vm8 = vcmp.ge.f32.partialorder %v459_v11, 0.0  ;;  %vm468_vm9 = vcmp.ge.f32.partialorder %v460_v12, 0.0 }
 0x15b   : > { %vm469_vm10 = vcmp.ge.f32.partialorder %v461_v14, 0.0  ;;  %v473_v17 = vmul.f32 0.2, %v457_v9  ;;  %v474_v18 = vmul.f32 0.2, %v458_v10  ;;  %vm470_vm11 = vcmp.ge.f32.partialorder %v462_v13, 0.0 }
 0x15c   : > { %v475_v19 = vmul.f32 0.2, %v459_v11  ;;  %v476_v20 = vmul.f32 0.2, %v460_v12  ;;  %v477_v21 = vmul.f32 0.2, %v461_v14 }
 0x15d   : > { %v478_v22 = vmul.f32 0.2, %v462_v13  ;;  %v479_v23 = vmul.f32 0.2, %v463_v15  ;;  %v481_v24 = vsel %vm465_vm6, %v457_v9, %v473_v17  ;;  %v482_v25 = vsel %vm466_vm7, %v458_v10, %v474_v18 }
 0x15e   : > { %vm471_vm12 = vcmp.ge.f32.partialorder %v463_v15, 0.0  ;;  %v480_v26 = vmul.f32 0.2, %v464_v16  ;;  %v483_v27 = vsel %vm467_vm8, %v459_v11, %v475_v19  ;;  %v484_v28 = vsel %vm468_vm9, %v460_v12, %v476_v20  ;;  %489 = vst [vmem:[%s163_s12] sm:$0xff] %v481_v24 }
 0x15f   : > { %vm472_vm13 = vcmp.ge.f32.partialorder %v464_v16, 0.0  ;;  %v485_v29 = vsel %vm469_vm10, %v461_v14, %v477_v21  ;;  %490 = vst [vmem:[%s163_s12 + $0x8] sm:$0xff] %v482_v25  ;;  %v486_v30 = vsel %vm470_vm11, %v462_v13, %v478_v22  ;;  %v487_v31 = vsel %vm471_vm12, %v463_v15, %v479_v23 }
 0x160   : > { %491 = vst [vmem:[%s163_s12 + $0x10] sm:$0xff] %v483_v27  ;;  %v488_v32 = vsel %vm472_vm13, %v464_v16, %v480_v26 }
 0x161   : > { %492 = vst [vmem:[%s163_s12 + $0x18] sm:$0xff] %v484_v28 }
 0x162   : > { %493 = vst [vmem:[%s163_s12 + $0x20] sm:$0xff] %v485_v29 }
 0x163   : > { %494 = vst [vmem:[%s163_s12 + $0x28] sm:$0xff] %v486_v30 }
 0x164   : > { %495 = vst [vmem:[%s163_s12 + $0x30] sm:$0xff] %v487_v31 }
 0x165   : > { %496 = vst [vmem:[%s163_s12 + $0x38] sm:$0xff] %v488_v32 }
 0x166   : > { %723 = shalt.err (!%p720_p5)
}
 0x167   : > { %636 = dma.vmem_to_hbm [thread:$0]  (%p832_p4), %s514_s24, 1024, %s516_s25, %s498_s26  }
 0x168 PF: > { %p642_p6 = scmp.ge.s32.totalorder %s774_s14, 2  ;;  %s527_s6 = sand.u32 1, %s754_s9  }
 0x169   : > { %s528_s7 = scalar_lea.sflag [#allocation3], %s527_s6 }
 0x16a   : > { %p639_p7 = pnand %p642_p6, %p839_p8 }
 0x16c   : > { %p640_p9 = pneg %p639_p7 }
 0x16e   : > { %749 = dma.done.wait (%p640_p9), %s528_s7, 1024  }
 0x16f   : > { %751 = vsyncadd (%p640_p9), %s528_s7, 4294966272  ;;  %s15_s14 = sadd.s32 1, %s774_s14   ;;  %s959_s9 = smov %s758_s10 }
 0x170   : > { %p12_p10 = scmp.ge.s32.totalorder %s15_s14, 4   ;;  %s960_s10 = smov %s762_s11 }
 0x171   : > { %s961_s11 = smov %s845_s22  ;;  %s962_s12 = smov %s770_s13 }
 0x172   : > { %s963_s13 = smov %s965_s17  ;;  %14 = sbr.rel (!%p12_p10) target bundleno = 4 (0x4), region = 69 }
 0x177   :  { %534 = vsyncpa [#allocation3], 1 }
 0x178   :  { %536 = vsyncpa [#allocation3 + $0x1], 1 }

</bundles_post_ra>
